<compile_context>
chip_gen: v5e
topology: v5e:2x2
jax: 0.10.0
libtpu: 0.0.40
codegen_flags: <defaults>
</compile_context>

<pallas_src>
import math

import jax
import jax.numpy as jnp
from jax.experimental import pallas as pl
from jax.experimental.pallas import tpu as pltpu


def _round_up(v: int, m: int) -> int:
    return ((v + m - 1) // m) * m


def _bin_kernel(x_ref, w_ref, neuro_ref, o_ref, acc_ref):
    # x_ref:     (tm, tk)   input tile
    # w_ref:     (tk, tn)   pre-sigmoided, pre-transposed weight tile (W_eff^T)
    # neuro_ref: (1, tn)    neurotransmitter signs
    # o_ref:     (tm, tn)   output tile
    # acc_ref:   (tm, tn)   f32 accumulator scratch (resident across k axis)
    k = pl.program_id(2)

    @pl.when(k == 0)
    def _():
        acc_ref[...] = jnp.zeros_like(acc_ref)

    acc_ref[...] += jnp.dot(x_ref[...], w_ref[...],
                            preferred_element_type=jnp.float32)

    @pl.when(k == pl.num_programs(2) - 1)
    def _():
        act = jax.nn.sigmoid(acc_ref[...])
        o_ref[...] = (act * neuro_ref[...].astype(jnp.float32)).astype(o_ref.dtype)


def bin_forward(x, weights, neurotransmitters, *, is_embed_layer: bool,
                is_last_layer: bool, tm: int = 256, tn: int = 256, tk: int = 512):
    """Pallas BIN forward. x: (N, *, H_in). Returns (N, *, H_out)."""
    del is_last_layer  # unused in forward (matches PyTorch module)
    out_features, in_features = weights.shape
    lead_shape = x.shape[:-1]
    m = int(math.prod(lead_shape))
    n = out_features
    k = in_features

    # One-time (amortized over all forward calls) weight preprocessing:
    # apply sigmoid unless embed layer, transpose to (K, N_out) for a lane-dense dot.
    w_eff_t = (weights if is_embed_layer else jax.nn.sigmoid(weights)).T
    w_eff_t = w_eff_t.astype(x.dtype)

    x2d = x.reshape(m, k)
    neuro2d = neurotransmitters.reshape(1, n).astype(x.dtype)

    # Clamp tile sizes to the (padded) problem dims; keep (8,128) granularity.
    tm = min(tm, _round_up(m, 8))
    tn = min(tn, _round_up(n, 128))
    tk = min(tk, _round_up(k, 128))
    m_pad = _round_up(m, tm)
    n_pad = _round_up(n, tn)
    k_pad = _round_up(k, tk)

    if (m_pad, k_pad) != (m, k):
        x2d = jnp.pad(x2d, ((0, m_pad - m), (0, k_pad - k)))
    if (k_pad, n_pad) != (k, n):
        w_eff_t = jnp.pad(w_eff_t, ((0, k_pad - k), (0, n_pad - n)))
    if n_pad != n:
        neuro2d = jnp.pad(neuro2d, ((0, 0), (0, n_pad - n)))

    grid = (m_pad // tm, n_pad // tn, k_pad // tk)

    itemsize = jnp.dtype(x.dtype).itemsize
    cost = pl.CostEstimate(
        flops=2 * m * k * n,
        transcendentals=m * n + (0 if is_embed_layer else n * k),
        bytes_accessed=(m * k + k * n + m * n + n + m * n) * itemsize,
    )

    # Small explicit VMEM budget: double-buffered input/output tiles + f32 acc.
    tile_bytes = 2 * (tm * tk + tk * tn + tm * tn + tn) * itemsize + tm * tn * 4
    vmem_limit = min(max(4 * tile_bytes, 16 * 1024 * 1024), 48 * 1024 * 1024)

    out2d = pl.pallas_call(
        _bin_kernel,
        out_shape=jax.ShapeDtypeStruct((m_pad, n_pad), x.dtype),
        grid=grid,
        in_specs=[
            pl.BlockSpec((tm, tk), lambda i, j, kk: (i, kk)),
            pl.BlockSpec((tk, tn), lambda i, j, kk: (kk, j)),
            pl.BlockSpec((1, tn), lambda i, j, kk: (0, j)),
        ],
        out_specs=pl.BlockSpec((tm, tn), lambda i, j, kk: (i, j)),
        scratch_shapes=[pltpu.VMEM((tm, tn), jnp.float32)],
        compiler_params=pltpu.CompilerParams(
            dimension_semantics=("parallel", "parallel", "arbitrary"),
            vmem_limit_bytes=int(vmem_limit),
        ),
        cost_estimate=cost,
    )(x2d, w_eff_t, neuro2d)

    out2d = out2d[:m, :n]
    return out2d.reshape(*lead_shape, n)


def init_bin_params(key, in_features, out_features, dtype=jnp.float32):
    """Deterministic parameter init matching the PyTorch module's shapes.

    kaiming_uniform_(a=sqrt(5)) with fan_in=in_features reduces to
    U(-1/sqrt(fan_in), +1/sqrt(fan_in)).
    """
    bound = 1.0 / math.sqrt(in_features)
    weights = jax.random.uniform(
        key, (out_features, in_features), dtype=dtype, minval=-bound, maxval=bound)
    neuro = jnp.ones((out_features,), dtype=dtype)
    neuro = neuro.at[out_features // 2:].set(-1.0)
    return weights, neuro


def _reference_forward(x, weights, neuro, *, is_embed_layer: bool):
    w_eff = weights if is_embed_layer else jax.nn.sigmoid(weights)
    act_pot = jnp.einsum("...k,nk->...n", x, w_eff)
    return jax.nn.sigmoid(act_pot) * neuro


if __name__ == "__main__":
    key = jax.random.PRNGKey(0)
    k_x, k_w = jax.random.split(key)

    # Small shapes consistent with Input: (N, *, H_in)
    N, S = 2, 8
    in_features, out_features = 32, 32

    x = jax.random.normal(k_x, (N, S, in_features), dtype=jnp.float32)
    weights, neuro = init_bin_params(k_w, in_features, out_features)

    # Hidden-layer path (sigmoid on weights).
    out = bin_forward(x, weights, neuro, is_embed_layer=False, is_last_layer=False)
    out = jax.block_until_ready(out)
    ref = _reference_forward(x, weights, neuro, is_embed_layer=False)
    assert out.shape == (N, S, out_features)
    assert jnp.allclose(out, ref, atol=1e-5, rtol=1e-5), "mismatch vs reference (hidden)"

    # Embed-layer path (raw weights).
    out_e = bin_forward(x, weights, neuro, is_embed_layer=True, is_last_layer=False)
    out_e = jax.block_until_ready(out_e)
    ref_e = _reference_forward(x, weights, neuro, is_embed_layer=True)
    assert jnp.allclose(out_e, ref_e, atol=1e-5, rtol=1e-5), "mismatch vs reference (embed)"

    print("KERNEL_OK")
</pallas_src>

<mosaic_0001>
module attributes {stable_mosaic.version = 11 : i64} {
  func.func @_bin_kernel(%arg0: i32, %arg1: i32, %arg2: i32, %arg3: memref<16x128xf32, #tpu.memory_space<vmem>>, %arg4: memref<128x128xf32, #tpu.memory_space<vmem>>, %arg5: memref<1x128xf32, #tpu.memory_space<vmem>>, %arg6: memref<16x128xf32, #tpu.memory_space<vmem>>, %arg7: memref<16x128xf32, #tpu.memory_space<vmem>>) attributes {dimension_semantics = [#tpu.dimension_semantics<parallel>, #tpu.dimension_semantics<parallel>, #tpu.dimension_semantics<arbitrary>], iteration_bounds = array<i64: 1, 1, 1>, scalar_prefetch = 0 : i64, scratch_operands = 1 : i64, tpu.core_type = #tpu.core_type<tc>, window_params = [{transform_indices = @transform_0, window_bounds = array<i64: 16, 128>}, {transform_indices = @transform_1, window_bounds = array<i64: 128, 128>}, {transform_indices = @transform_2, window_bounds = array<i64: 1, 128>}, {transform_indices = @transform_3, window_bounds = array<i64: 16, 128>}]} {
    %c0_i32 = arith.constant 0 : i32
    %0 = arith.cmpi eq, %arg2, %c0_i32 : i32
    %1 = arith.extui %0 : i1 to i32
    %c0_i32_0 = arith.constant 0 : i32
    %2 = arith.cmpi ne, %1, %c0_i32_0 : i32
    scf.if %2 {
      %cst_10 = arith.constant 0.000000e+00 : f32
      %12 = vector.broadcast %cst_10 : f32 to vector<16x128xf32>
      %c0_11 = arith.constant 0 : index
      %c0_12 = arith.constant 0 : index
      %13 = vector.load %arg7[%c0_11, %c0_12] : memref<16x128xf32, #tpu.memory_space<vmem>>, vector<16x128xf32>
      tpu.vector_store %arg7[%c0_11, %c0_12], %12 {strides = array<i32>} : memref<16x128xf32, #tpu.memory_space<vmem>>, vector<16x128xf32>,
    } else {
    }
    %c0 = arith.constant 0 : index
    %c0_1 = arith.constant 0 : index
    %3 = vector.load %arg7[%c0, %c0_1] : memref<16x128xf32, #tpu.memory_space<vmem>>, vector<16x128xf32>
    %c0_2 = arith.constant 0 : index
    %c0_3 = arith.constant 0 : index
    %4 = vector.load %arg3[%c0_2, %c0_3] : memref<16x128xf32, #tpu.memory_space<vmem>>, vector<16x128xf32>
    %c0_4 = arith.constant 0 : index
    %c0_5 = arith.constant 0 : index
    %5 = vector.load %arg4[%c0_4, %c0_5] : memref<128x128xf32, #tpu.memory_space<vmem>>, vector<128x128xf32>
    %cst = arith.constant dense<0.000000e+00> : vector<16x128xf32>
    %6 = tpu.matmul %4, %5, %cst {dimension_numbers = #tpu.dot_dimension_numbers<[1], [0], [0], [1], [0, 0, 1, 1], [], []>} : vector<16x128xf32>, vector<128x128xf32>, vector<16x128xf32> -> vector<16x128xf32>
    %7 = arith.addf %3, %6 : vector<16x128xf32>
    %c0_6 = arith.constant 0 : index
    %c0_7 = arith.constant 0 : index
    %8 = vector.load %arg7[%c0_6, %c0_7] : memref<16x128xf32, #tpu.memory_space<vmem>>, vector<16x128xf32>
    tpu.vector_store %arg7[%c0_6, %c0_7], %7 {strides = array<i32>} : memref<16x128xf32, #tpu.memory_space<vmem>>, vector<16x128xf32>,
    %c0_i32_8 = arith.constant 0 : i32
    %9 = arith.cmpi eq, %arg2, %c0_i32_8 : i32
    %10 = arith.extui %9 : i1 to i32
    %c0_i32_9 = arith.constant 0 : i32
    %11 = arith.cmpi ne, %10, %c0_i32_9 : i32
    scf.if %11 {
      %c0_10 = arith.constant 0 : index
      %c0_11 = arith.constant 0 : index
      %12 = vector.load %arg7[%c0_10, %c0_11] : memref<16x128xf32, #tpu.memory_space<vmem>>, vector<16x128xf32>
      %13 = arith.negf %12 : vector<16x128xf32>
      %14 = math.exp %13 : vector<16x128xf32>
      %cst_12 = arith.constant 1.000000e+00 : f32
      %15 = vector.broadcast %cst_12 : f32 to vector<16x128xf32>
      %16 = arith.addf %15, %14 : vector<16x128xf32>
      %17 = arith.divf %15, %16 : vector<16x128xf32>
      %c0_13 = arith.constant 0 : index
      %c0_14 = arith.constant 0 : index
      %18 = vector.load %arg5[%c0_13, %c0_14] : memref<1x128xf32, #tpu.memory_space<vmem>>, vector<1x128xf32>
      %19 = vector.broadcast %18 : vector<1x128xf32> to vector<16x128xf32>
      %20 = arith.mulf %17, %19 : vector<16x128xf32>
      %c0_15 = arith.constant 0 : index
      %c0_16 = arith.constant 0 : index
      %21 = vector.load %arg6[%c0_15, %c0_16] : memref<16x128xf32, #tpu.memory_space<vmem>>, vector<16x128xf32>
      tpu.vector_store %arg6[%c0_15, %c0_16], %20 {strides = array<i32>} : memref<16x128xf32, #tpu.memory_space<vmem>>, vector<16x128xf32>,
    } else {
    }
    return
  }
  func.func @transform_0(%arg0: i32, %arg1: i32, %arg2: i32) -> (i32, i32) {
    %c0_i32 = arith.constant 0 : i32
    return %arg0, %arg2 : i32, i32
  }
  func.func @transform_1(%arg0: i32, %arg1: i32, %arg2: i32) -> (i32, i32) {
    %c0_i32 = arith.constant 0 : i32
    return %arg2, %arg1 : i32, i32
  }
  func.func @transform_2(%arg0: i32, %arg1: i32, %arg2: i32) -> (i32, i32) {
    %c0_i32 = arith.constant 0 : i32
    %c0_i32_0 = arith.constant 0 : i32
    return %c0_i32, %arg1 : i32, i32
  }
  func.func @transform_3(%arg0: i32, %arg1: i32, %arg2: i32) -> (i32, i32) {
    %c0_i32 = arith.constant 0 : i32
    return %arg0, %arg1 : i32, i32
  }
}

</mosaic_0001>

<bundles_post_ra>
// kernel: tpu_custom_call.1
= control target key start
LH: loop header
LB: loop body
LE: loop exit
PB: predicated region body
PF: predicated region fallthrough
CT: control target
= control target key end

     0   :  { %8 = vsyncpa [#allocation4], 0  ;;  %s327_s0 = inlined_call_operand.hbm [shape: f32[16,128], index: 0, kind: input, shape index: {}]   ;;  %s328_s1 = inlined_call_operand.hbm [shape: f32[128,128], index: 1, kind: input, shape index: {}]   ;;  %s329_s2 = inlined_call_operand.vmem [shape: f32[1,128], index: 2, kind: input, shape index: {}]   ;;  %s330_s3 = inlined_call_operand.hbm [shape: f32[16,128], index: 3, kind: output, shape index: {}]  }
   0x1   :  { %9 = vsyncpa [#allocation7], 0 }
   0x2   :  { %10 = vsyncpa [#allocation5], 0  ;;  %s15_s14 = sshll.u32 %s327_s0, 4  ;;  %s281_s15 = smov [#allocation3]   ;;  %s16_s14 = int_to_ptr.hbm [resolvable:$true] %s15_s14 }
   0x3   :  { %s17_s16 = sshll.u32 %s281_s15, 4  ;;  %s28_s19 = sshll.u32 %s328_s1, 4  ;;  %s18_s16 = int_to_ptr.vmem [resolvable:$true] %s17_s16  ;;  %s29_s19 = int_to_ptr.hbm [resolvable:$true] %s28_s19 }
   0x4   :  { %s282_s20 = smov 128   ;;  %s283_s21 = smov 8  }
   0x5   :  { %23 = dma.hbm_to_vmem [thread:$0]  %s16_s14, 256, %s18_s16, [#allocation4], %s282_s20, %s282_s20, %s283_s21  }
   0x6   :  { %s284_s22 = smov [#allocation6]  }
   0x7   :  { %s30_s23 = sshll.u32 %s284_s22, 4  ;;  %s31_s23 = int_to_ptr.vmem [resolvable:$true] %s30_s23 }
   0x8   :  { %36 = dma.hbm_to_vmem [thread:$0]  %s29_s19, 2048, %s31_s23, [#allocation7], %s282_s20, %s282_s20, %s283_s21  }
   0x9   :  { %275 = dma.done.wait [#allocation4], 256  }
   0xa   :  { %276 = vsyncadd [#allocation4], 4294967040 }
   0xb   :  { %277 = dma.done.wait [#allocation7], 2048  }
   0xc   :  { %278 = vsyncadd [#allocation7], 4294965248  ;;  %v72_v0 = vld [vmem:[#allocation6 + $0x78] sm:$0xff]  ;;  %v71_v1 = vld [vmem:[#allocation6 + $0x70] sm:$0xff]  ;;  %s285_s24 = smov [#allocation8]   ;;  %s157_s28 = sshll.u32 %s330_s3, 4  ;;  %s158_s28 = int_to_ptr.hbm [resolvable:$true] %s157_s28 }
   0xd   :  { %73 = vmatpush.msra.mxu0 %v72_v0  ;;  %173 = vmatpush.msra.mxu1 %v72_v0  ;;  %v70_v2 = vld [vmem:[#allocation6 + $0x68] sm:$0xff]  ;;  %v69_v3 = vld [vmem:[#allocation6 + $0x60] sm:$0xff]  ;;  %v68_v4 = vld [vmem:[#allocation6 + $0x58] sm:$0xff]  ;;  %s155_s25 = sshll.u32 %s285_s24, 4  ;;  %s156_s25 = int_to_ptr.vmem [resolvable:$true] %s155_s25 }
   0xe   :  { %v67_v5 = vld [vmem:[#allocation6 + $0x50] sm:$0xff]  ;;  %v66_v6 = vld [vmem:[#allocation6 + $0x48] sm:$0xff]  ;;  %v65_v7 = vld [vmem:[#allocation6 + $0x40] sm:$0xff] }
   0xf   :  { %74 = vmatpush.msra.mxu0 %v71_v1  ;;  %174 = vmatpush.msra.mxu1 %v71_v1  ;;  %v64_v8 = vld [vmem:[#allocation6 + $0x38] sm:$0xff]  ;;  %v63_v9 = vld [vmem:[#allocation6 + $0x30] sm:$0xff]  ;;  %v62_v10 = vld [vmem:[#allocation6 + $0x28] sm:$0xff] }
  0x10   :  { %v61_v11 = vld [vmem:[#allocation6 + $0x20] sm:$0xff]  ;;  %v60_v12 = vld [vmem:[#allocation6 + $0x18] sm:$0xff]  ;;  %v59_v13 = vld [vmem:[#allocation6 + $0x10] sm:$0xff] }
  0x11   :  { %75 = vmatpush.msra.mxu0 %v70_v2  ;;  %175 = vmatpush.msra.mxu1 %v70_v2  ;;  %v58_v14 = vld [vmem:[#allocation6 + $0x8] sm:$0xff]  ;;  %v57_v15 = vld [vmem:[#allocation6] sm:$0xff]  ;;  %v55_v16 = vld [vmem:[#allocation3] sm:$0xff] }
  0x12   :  { %v56_v17 = vld [vmem:[#allocation3 + $0x8] sm:$0xff]  ;;  %v194_v39 = vld [vmem:[%s329_s2] ss:$0 sm:$0xff] }
  0x13   :  { %76 = vmatpush.msra.mxu0 %v69_v3  ;;  %176 = vmatpush.msra.mxu1 %v69_v3 }
  0x15   :  { %77 = vmatpush.msra.mxu0 %v68_v4  ;;  %177 = vmatpush.msra.mxu1 %v68_v4 }
  0x17   :  { %78 = vmatpush.msra.mxu0 %v67_v5  ;;  %178 = vmatpush.msra.mxu1 %v67_v5 }
  0x19   :  { %79 = vmatpush.msra.mxu0 %v66_v6  ;;  %179 = vmatpush.msra.mxu1 %v66_v6 }
  0x1b   :  { %80 = vmatpush.msra.mxu0 %v65_v7  ;;  %180 = vmatpush.msra.mxu1 %v65_v7 }
  0x1d   :  { %81 = vmatpush.msra.mxu0 %v64_v8  ;;  %181 = vmatpush.msra.mxu1 %v64_v8 }
  0x1f   :  { %82 = vmatpush.msra.mxu0 %v63_v9  ;;  %182 = vmatpush.msra.mxu1 %v63_v9 }
  0x21   :  { %83 = vmatpush.msra.mxu0 %v62_v10  ;;  %183 = vmatpush.msra.mxu1 %v62_v10 }
  0x23   :  { %84 = vmatpush.msra.mxu0 %v61_v11  ;;  %184 = vmatpush.msra.mxu1 %v61_v11 }
  0x25   :  { %85 = vmatpush.msra.mxu0 %v60_v12  ;;  %185 = vmatpush.msra.mxu1 %v60_v12 }
  0x27   :  { %86 = vmatpush.msra.mxu0 %v59_v13  ;;  %186 = vmatpush.msra.mxu1 %v59_v13 }
  0x29   :  { %87 = vmatpush.msra.mxu0 %v58_v14  ;;  %187 = vmatpush.msra.mxu1 %v58_v14 }
  0x2b   :  { %88 = vmatpush.msra.mxu0 %v57_v15  ;;  %188 = vmatpush.msra.mxu1 %v57_v15 }
  0x2c   :  { %89 = vmatmul.f32.vlgmr.msra.gmra.mxu0 %v55_v16  ;;  %92 = vmatmul.f32.vlgmr.msra.gmra.mxu1 %v56_v17 }
  0xa9   :  { %v90_v18 = vpop.f32.mrf.mxu0  ;;  %v93_v19 = vpop.f32.mrf.mxu1 }
  0xaa   :  { %v171_v20 = vmul.f32 -1.442695, %v90_v18  ;;  %v172_v21 = vmul.f32 -1.442695, %v93_v19 }
  0xac   :  { %195 = vpow2.f32 %v171_v20 }
  0xad   :  { %197 = vpow2.f32 %v172_v21 }
  0xb2   :  { %v196_v22 = vpop.eup %195 }
  0xb3   :  { %v198_v23 = vpop.eup %197  ;;  %v111_v24 = vadd.f32 1.0, %v196_v22 }
  0xb4   :  { %v112_v25 = vadd.f32 1.0, %v198_v23 }
  0xb5   :  { %199 = vrcp.f32 %v111_v24  ;;  %v124_v32 = vand.u32 2147483648, %v111_v24  ;;  %v122_v34 = vand.u32 2147483647, %v111_v24  ;;  %vm118_vm2 = vweird.f32 %v111_v24 }
  0xb6   :  { %201 = vrcp.f32 %v112_v25  ;;  %v139_v35 = vand.u32 2147483648, %v112_v25  ;;  %v137_v37 = vand.u32 2147483647, %v112_v25  ;;  %vm133_vm4 = vweird.f32 %v112_v25 }
  0xb7   :  { %v125_v40 = vor.u32 1.1754944e-38, %v124_v32  ;;  %vm123_vm5 = vcmp.eq.f32.partialorder %v122_v34, 8.507059e+37 }
  0xb8   :  { %v140_v43 = vor.u32 1.1754944e-38, %v139_v35  ;;  %vm138_vm7 = vcmp.eq.f32.partialorder %v137_v37, 8.507059e+37 }
  0xbb   :  { %v200_v26 = vpop.eup %199 }
  0xbc   :  { %v202_v27 = vpop.eup %201  ;;  %v114_v28 = vmul.f32 %v200_v26, %v111_v24  ;;  %vm119_vm0 = vweird.f32 %v200_v26 }
  0xbd   :  { %v129_v29 = vmul.f32 %v202_v27, %v112_v25  ;;  %vm134_vm1 = vweird.f32 %v202_v27  ;;  %vm120_vm3 = vmor %vm118_vm2, %vm119_vm0 }
  0xbe   :  { %v115_v30 = vsub.f32 1.0, %v114_v28  ;;  %vm135_vm6 = vmor %vm133_vm4, %vm134_vm1 }
  0xbf   :  { %v130_v31 = vsub.f32 1.0, %v129_v29 }
  0xc0   :  { %v116_v33 = vmul.f32 %v200_v26, %v115_v30 }
  0xc1   :  { %v131_v36 = vmul.f32 %v202_v27, %v130_v31 }
  0xc2   :  { %v117_v38 = vadd.f32 %v200_v26, %v116_v33 }
  0xc3   :  { %v132_v41 = vadd.f32 %v202_v27, %v131_v36 }
  0xc4   :  { %v121_v42 = vsel %vm120_vm3, %v200_v26, %v117_v38 }
  0xc5   :  { %v126_v44 = vsel %vm123_vm5, %v125_v40, %v121_v42  ;;  %v136_v45 = vsel %vm135_vm6, %v202_v27, %v132_v41 }
  0xc6   :  { %v141_v46 = vsel %vm138_vm7, %v140_v43, %v136_v45  ;;  %v147_v47 = vmul.f32 %v194_v39, %v126_v44 }
  0xc7   :  { %v148_v48 = vmul.f32 %v194_v39, %v141_v46 }
  0xc8   :  { %149 = vst [vmem:[#allocation8] sm:$0xff] %v147_v47 }
  0xc9   :  { %150 = vst [vmem:[#allocation8 + $0x8] sm:$0xff] %v148_v48 }
  0xca   :  { %163 = dma.vmem_to_hbm [thread:$0]  %s156_s25, 256, %s158_s28, [#allocation5], %s282_s20, %s282_s20, %s283_s21  }
  0xcb   :  { %279 = dma.done.wait [#allocation5], 256  }
  0xcc   :  { %280 = vsyncadd [#allocation5], 4294967040 }
  0xcd   :  { %168 = vsyncpa [#allocation4], 1 }
  0xce   :  { %169 = vsyncpa [#allocation7], 1 }
  0xcf   :  { %170 = vsyncpa [#allocation5], 1 }

</bundles_post_ra>
